<compile_context>
chip_gen: v6e
topology: v6e:2x2x1
jax: 0.10.0
libtpu: 0.0.40
codegen_flags: <defaults>
</compile_context>

<pallas_src>
import math

import jax
import jax.numpy as jnp
from jax.experimental import pallas as pl
from jax.experimental.pallas import tpu as pltpu


def make_positional_encoding(d_model: int, max_len: int = 5000) -> jnp.ndarray:
    """Deterministic pe table, identical to the PyTorch buffer: (max_len, 1, d_model) f32."""
    position = jnp.arange(0, max_len, dtype=jnp.float32)[:, None]              # (max_len, 1)
    div_term = jnp.exp(
        jnp.arange(0, d_model, 2, dtype=jnp.float32) * (-math.log(10000.0) / d_model)
    )                                                                           # (d_model//2,)
    pe = jnp.zeros((max_len, d_model), dtype=jnp.float32)
    pe = pe.at[:, 0::2].set(jnp.sin(position * div_term))
    pe = pe.at[:, 1::2].set(jnp.cos(position * div_term))
    return pe[:, None, :]                                                       # (max_len, 1, d_model)


def _pe_add_kernel(x_ref, pe_ref, o_ref):
    # x_ref/o_ref: (ts, B, D); pe_ref: (ts, 1, D).
    # Batch broadcast happens here (sublane broadcast + vadd) instead of being
    # materialized in HBM.  Add in f32, cast once on store.
    o_ref[...] = (x_ref[...].astype(jnp.float32) + pe_ref[...]).astype(o_ref.dtype)


def _padded_row_bytes(rows_2nd_minor: int, d_model: int, dtype) -> int:
    """VMEM bytes of one leading-dim row of a (ts, rows, D) block after (sublane, lane) padding."""
    itemsize = jnp.dtype(dtype).itemsize
    sub = max(8, 8 * (4 // itemsize))          # 8 for f32, 16 for bf16, 32 for int8/fp8
    rp = -(-rows_2nd_minor // sub) * sub
    dp = -(-d_model // 128) * 128
    return rp * dp * itemsize


def _pick_tile_rows(seq_len: int, bytes_per_row: int,
                    vmem_budget_bytes: int = 24 * 1024 * 1024) -> int:
    """Largest multiple-of-8 sequence-tile with double-buffered (x+out+pe) <= ~24 MiB.

    24 MiB keeps ~8 MiB headroom under the 32 MiB scoped VMEM limit, which is the
    binding constraint on v7x (64 MiB physical); v5e/v6e have more physical VMEM
    but the same scoped default.
    """
    per_step = vmem_budget_bytes // 2                 # double buffering
    ts = max(8, (per_step // max(bytes_per_row, 1)) // 8 * 8)
    if seq_len > 8:
        # Guarantee >= 2 grid steps so dimension_semantics=("parallel",) can
        # shard tiles across v7x's two TensorCores (neutral on v5e/v6e).
        half = (seq_len + 1) // 2
        half = ((half + 7) // 8) * 8
        ts = min(ts, half)
    return min(ts, seq_len)


def _positional_encoding_forward_impl(x: jnp.ndarray, pe_full: jnp.ndarray) -> jnp.ndarray:
    """x: (seq, batch, d_model); pe_full: (max_len, 1, d_model) f32."""
    S, B, D = x.shape
    max_len = pe_full.shape[0]
    assert S <= max_len, "sequence longer than the positional-encoding table"

    x_row = _padded_row_bytes(B, D, x.dtype)           # one seq-row of an x / out block
    pe_row = _padded_row_bytes(1, D, pe_full.dtype)    # one seq-row of a pe block
    ts = _pick_tile_rows(S, 2 * x_row + pe_row)

    grid = (pl.cdiv(S, ts),)                           # ragged last tile handled by Pallas

    return pl.pallas_call(
        _pe_add_kernel,
        out_shape=jax.ShapeDtypeStruct((S, B, D), x.dtype),
        grid=grid,
        in_specs=[
            pl.BlockSpec((ts, B, D), lambda i: (i, 0, 0)),   # x tile (full B, D per block)
            pl.BlockSpec((ts, 1, D), lambda i: (i, 0, 0)),   # pe tile: only S*D bytes ever read
        ],
        out_specs=pl.BlockSpec((ts, B, D), lambda i: (i, 0, 0)),
        input_output_aliases={0: 0},                   # write in place over x's buffer
        compiler_params=pltpu.CompilerParams(
            dimension_semantics=("parallel",),
            vmem_limit_bytes=32 * 1024 * 1024,
        ),
    )(x, pe_full)


# Public entry point: x is donated so the in-place alias actually sticks
# (no defensive copy).  Do NOT read x after calling this.
positional_encoding_forward = jax.jit(_positional_encoding_forward_impl, donate_argnums=(0,))


if __name__ == "__main__":
    d_model = 32
    max_len = 64          # small synthetic max_len (module default is 5000)
    seq, batch = 32, 2    # gives a 2-step grid -> exercises multi-tile path

    key = jax.random.PRNGKey(0)
    x = jax.random.normal(key, (seq, batch, d_model), dtype=jnp.float32)

    pe_full = make_positional_encoding(d_model, max_len)   # (max_len, 1, d_model)

    # Reference in plain JAX (same math as torch forward).  Computed and
    # materialized BEFORE the kernel call because x is donated / overwritten.
    ref = jax.block_until_ready(x + pe_full[:seq])

    out = positional_encoding_forward(x, pe_full)
    out = jax.block_until_ready(out)
    # NOTE: x must not be used past this point (its buffer was donated).

    assert out.shape == (seq, batch, d_model)
    assert jnp.allclose(out, ref, atol=1e-6), "mismatch vs reference"

    print("KERNEL_OK")
</pallas_src>

<mosaic_0001>
module attributes {stable_mosaic.version = 11 : i64} {
  func.func @_pe_add_kernel(%arg0: i32, %arg1: memref<16x2x32xf32, #tpu.memory_space<vmem>>, %arg2: memref<16x1x32xf32, #tpu.memory_space<vmem>>, %arg3: memref<16x2x32xf32, #tpu.memory_space<vmem>>) attributes {dimension_semantics = [#tpu.dimension_semantics<parallel>], iteration_bounds = array<i64: 2>, scalar_prefetch = 0 : i64, scratch_operands = 0 : i64, tpu.core_type = #tpu.core_type<tc>, window_params = [{transform_indices = @transform_0, window_bounds = array<i64: 16, 2, 32>}, {transform_indices = @transform_1, window_bounds = array<i64: 16, 1, 32>}, {transform_indices = @transform_2, window_bounds = array<i64: 16, 2, 32>}]} {
    %c0 = arith.constant 0 : index
    %c0_0 = arith.constant 0 : index
    %c0_1 = arith.constant 0 : index
    %0 = vector.load %arg1[%c0, %c0_0, %c0_1] : memref<16x2x32xf32, #tpu.memory_space<vmem>>, vector<16x2x32xf32>
    %c0_2 = arith.constant 0 : index
    %c0_3 = arith.constant 0 : index
    %c0_4 = arith.constant 0 : index
    %1 = vector.load %arg2[%c0_2, %c0_3, %c0_4] : memref<16x1x32xf32, #tpu.memory_space<vmem>>, vector<16x1x32xf32>
    %2 = vector.broadcast %1 : vector<16x1x32xf32> to vector<16x2x32xf32>
    %3 = arith.addf %0, %2 : vector<16x2x32xf32>
    %c0_5 = arith.constant 0 : index
    %c0_6 = arith.constant 0 : index
    %c0_7 = arith.constant 0 : index
    %4 = vector.load %arg3[%c0_5, %c0_6, %c0_7] : memref<16x2x32xf32, #tpu.memory_space<vmem>>, vector<16x2x32xf32>
    tpu.vector_store %arg3[%c0_5, %c0_6, %c0_7], %3 {strides = array<i32>} : memref<16x2x32xf32, #tpu.memory_space<vmem>>, vector<16x2x32xf32>,
    return
  }
  func.func @transform_0(%arg0: i32) -> (i32, i32, i32) {
    %c0_i32 = arith.constant 0 : i32
    %c0_i32_0 = arith.constant 0 : i32
    %c0_i32_1 = arith.constant 0 : i32
    return %arg0, %c0_i32, %c0_i32_0 : i32, i32, i32
  }
  func.func @transform_1(%arg0: i32) -> (i32, i32, i32) {
    %c0_i32 = arith.constant 0 : i32
    %c0_i32_0 = arith.constant 0 : i32
    %c0_i32_1 = arith.constant 0 : i32
    return %arg0, %c0_i32, %c0_i32_0 : i32, i32, i32
  }
  func.func @transform_2(%arg0: i32) -> (i32, i32, i32) {
    %c0_i32 = arith.constant 0 : i32
    %c0_i32_0 = arith.constant 0 : i32
    %c0_i32_1 = arith.constant 0 : i32
    return %arg0, %c0_i32, %c0_i32_0 : i32, i32, i32
  }
}

</mosaic_0001>

<bundles_post_ra>
// kernel: _positional_encoding_forward_impl.1
= control target key start
LH: loop header
LB: loop body
LE: loop exit
PB: predicated region body
PF: predicated region fallthrough
CT: control target
= control target key end

     0   :  { %7 = vsyncpa [#allocation3], 0  ;;  %s871_s0 = inlined_call_operand.hbm [shape: f32[32,2,32], index: 0, kind: input, shape index: {}, may-alias: {0,2}]   ;;  %s872_s1 = inlined_call_operand.vmem [shape: f32[64,1,32], index: 1, kind: input, shape index: {}]   ;;  %s873_s2 = inlined_call_operand.hbm [shape: f32[32,2,32], index: 2, kind: output, shape index: {}, may-alias: {0,2}]  }
   0x1   :  { %9 = vsyncpa [#allocation3 + $0x1], 0 }
   0x2   :  { %10 = vsyncpa [#allocation4], 0 }
   0x3   :  { %12 = vsyncpa [#allocation4 + $0x1], 0  ;;  %s638_s9 = smov 0   ;;  %s640_s10 = smov 0  }
   0x4   :  { %s642_s11 = smov 0   ;;  %s644_s12 = smov 0  }
   0x5 LB: > { %s659_s13 = sadd.s32 4294967295, %s615_s12   ;;  %s440_s14 = sadd.s32 4294967294, %s615_s12   ;;  %s615_s12 = sphi %s644_s12, %s888_s12   ;;  %s611_s11 = sphi %s642_s11, %s887_s11   ;;  %s607_s10 = sphi %s640_s10, %s886_s10   ;;  %s603_s9 = sphi %s638_s9, %s885_s9  }
   0x6   : > { %s663_s15 = sadd.s32 1, %s615_s12   ;;  %s25_s16 = sadd.s32 1, %s611_s11 }
   0x7   : > { %s22_s17 = ssub.s32 %s615_s12, %s663_s15  ;;  %p32_p0 = scmp.ne.s32.totalorder %s611_s11, %s607_s10 }
   0x8   : > { %p23_p1 = scmp.eq.s32.totalorder %s22_s17, 0  ;;  %p33_p2 = scmp.eq.s32.totalorder %s615_s12, 0 }
   0x9   : > { %p38_p3 = scmp.ne.s32.totalorder %s607_s10, %s603_s9  ;;  %p39_p4 = scmp.eq.s32.totalorder %s659_s13, 0 }
   0xa   : > { %s675_s18 = scalar_select %p23_p1, %s611_s11, %s25_s16  }
   0xb   : > { %p677_p5 = por %p33_p2, %p32_p0  ;;  %p681_p6 = por %p39_p4, %p38_p3 }
   0xc   : > { %p88_p7 = scmp.eq.s32.totalorder %s659_s13, 1  ;;  %p94_p8 = scmp.eq.s32.totalorder %s440_s14, 1 }
   0xd   : > { %s877_s20 = scalar_select %p681_p6, 1, 0 }
   0xe   : > { %p485_p10 = scmp.lt.s32.totalorder %s615_s12, 2  ;;  %p688_p11 = por %p88_p7, %p32_p0 }
   0xf   : > { %p692_p12 = por %p94_p8, %p38_p3  ;;  %s114_s23 = sand.u32 1, %s611_s11  }
  0x10   : > { %s878_s21 = scalar_select %p688_p11, 1, 0 }
  0x11   : > { %s879_s22 = scalar_select %p692_p12, 1, 0 }
  0x12   : > { %s471_s24 = sshll.u32 %s615_s12, 9  ;;  %s443_s25 = sshll.u32 %s114_s23, 5 }
  0x13   : > { %s701_s28 = scalar_lea.hbm %s871_s0, %s471_s24  ;;  %s118_s29 = scalar_lea.vmem [#allocation2], %s443_s25 }
  0x14   : > { %s125_s30 = sshll.u32 %s118_s29, 4  ;;  %p705_p13 = pnand %p485_p10, %p677_p5  ;;  %s709_s30 = int_to_ptr.vmem [resolvable:$true] %s125_s30 }
  0x15   : > { %s711_s4 = scalar_lea.sflag [#allocation3], %s114_s23  ;;  %s523_s5 = scalar_lea.hbm %s701_s28, 512 }
  0x16   : > { %p524_p0 = scmp.ne.s32.totalorder %s701_s28, %s523_s5  ;;  %p525_p1 = pneg %p705_p13 }
  0x17   : > { %s528_s8 = scalar_lea.hbm %s871_s0, 1024  ;;  %p529_p4 = scmp.lt.s32.totalorder %s701_s28, %s871_s0 }
  0x18   : > { %p526_p2 = pnand %p525_p1, %p524_p0  ;;  %p530_p5 = scmp.lt.s32.totalorder %s528_s8, %s523_s5 }
  0x1a   : > { %p527_p3 = pneg %p526_p2  ;;  %p531_p7 = por %p530_p5, %p529_p4 }
  0x1c   : > { %p532_p8 = pnand %p531_p7, %p527_p3 }
  0x1e   : > { %535 = shalt.err (!%p532_p8)
}
  0x1f   : > { %s536_s17 = scalar_lea.vmem %s709_s30, 512  ;;  %s617_s19 = smov [#allocation2]  }
  0x20   : > { %p537_p10 = scmp.ne.s32.totalorder %s709_s30, %s536_s17  ;;  %s541_s23 = sshll.u32 %s617_s19, 4  ;;  %s542_s23 = int_to_ptr.vmem [resolvable:$false] %s541_s23 }
  0x21   : > { %s543_s24 = scalar_lea.vmem %s542_s23, 1024  ;;  %p544_p2 = scmp.lt.s32.totalorder %s709_s30, %s542_s23 }
  0x22   : > { %p539_p9 = pnand %p537_p10, %p525_p1  ;;  %p545_p12 = scmp.lt.s32.totalorder %s543_s24, %s536_s17 }
  0x24   : > { %p540_p0 = pneg %p539_p9  ;;  %p546_p11 = por %p545_p12, %p544_p2 }
  0x26   : > { %p547_p6 = pnand %p546_p11, %p540_p0 }
  0x28   : > { %550 = shalt.err (!%p547_p6)
}
  0x29   : > { %s618_s25 = smov 32   ;;  %s619_s26 = smov 2  }
  0x2a   : > { %480 = dma.hbm_to_vmem [thread:$0]  (!%p705_p13), %s701_s28, 512, %s709_s30, %s711_s4, %s618_s25, %s618_s25, %s619_s26  }
  0x2b   : > { %p446_p9 = scmp.ge.s32.totalorder %s615_s12, 1  ;;  %p141_p1 = scmp.lt.s32.totalorder %s615_s12, 3 }
  0x2d   : > { %p142_p3 = pnand %p446_p9, %p141_p1 }
  0x2e   : > { %s735_s27 = sand.u32 (!%p142_p3), 1, %s607_s10   ;;  %p881_p6 = scmp.ne.s32.totalorder (!%p142_p3), %s877_s20, 0 }
  0x2f   : > { %145 = sbr.rel (%p142_p3) target bundleno = 92 (0x5c), region = 28  ;;  %s447_s29 = sshll.u32 (!%p142_p3), %s735_s27, 5 }
  0x30   : > { %s148_s5 = scalar_lea.sflag (!%p142_p3), [#allocation3], %s735_s27  ;;  %s739_s6 = scalar_lea.vmem (!%p142_p3), [#allocation2], %s447_s29 }
  0x34   : > { %594 = dma.done.wait (%p881_p6), %s148_s5, 512  }
  0x35   : > { %596 = vsyncadd (%p881_p6), %s148_s5, 4294966784  ;;  %s449_s28 = sshll.u32 %s659_s13, 4  ;;  %vm327_vm0 = vcmask 254976   ;;  %s472_s20 = sshll.u32 %s659_s13, 9  ;;  %v183_v0 = vld [vmem:[%s739_s6] sm:$0x3] }
  0x36   : > { %p178_p11 = scmp.lt.s32.totalorder %s449_s28, 63  ;;  %s752_s7 = scalar_lea.vmem [#allocation5], %s447_s29  ;;  %v184_v2 = vld [vmem:[%s739_s6 + $0x2] sm:$0x3]  ;;  %v185_v5 = vld [vmem:[%s739_s6 + $0x4] sm:$0x3] }
  0x37   : > { %s358_s8 = sshll.u32 %s752_s7, 4  ;;  %v186_v9 = vld [vmem:[%s739_s6 + $0x6] sm:$0x3]  ;;  %v187_v11 = vld [vmem:[%s739_s6 + $0x8] sm:$0x3]  ;;  %s816_s17 = scalar_lea.hbm %s873_s2, %s472_s20  ;;  %s820_s8 = int_to_ptr.vmem [resolvable:$true] %s358_s8 }
  0x38   : > { %s890_s28 = smov (!%p178_p11, %s449_s28), 63  ;;  %v188_v14 = vld [vmem:[%s739_s6 + $0xa] sm:$0x3]  ;;  %v189_v18 = vld [vmem:[%s739_s6 + $0xc] sm:$0x3]  ;;  %s345_s13 = scalar_lea.sflag [#allocation4], %s735_s27 }
  0x39   : > { %s749_s4 = scalar_lea.vmem %s872_s1, %s890_s28  ;;  %v190_v20 = vld [vmem:[%s739_s6 + $0xe] sm:$0x3]  ;;  %v191_v23 = vld [vmem:[%s739_s6 + $0x10] sm:$0x3]  ;;  %v192_v27 = vld [vmem:[%s739_s6 + $0x12] sm:$0x3] }
  0x3a   : > { %v450_v1 = vld [vmem:[%s749_s4] ss:$0 sm:$0xff]  ;;  %v451_v4 = vld [vmem:[%s749_s4 + $0x1] ss:$0 sm:$0xff]  ;;  %v452_v6 = vld [vmem:[%s749_s4 + $0x2] ss:$0 sm:$0xff] }
  0x3b   : > { %v311_v3 = vadd.f32 %v450_v1, %v183_v0  ;;  %v312_v7 = vadd.f32 %v451_v4, %v184_v2  ;;  %v313_v8 = vadd.f32 %v452_v6, %v185_v5  ;;  %v453_v10 = vld [vmem:[%s749_s4 + $0x3] ss:$0 sm:$0xff]  ;;  %v454_v13 = vld [vmem:[%s749_s4 + $0x4] ss:$0 sm:$0xff]  ;;  %v455_v15 = vld [vmem:[%s749_s4 + $0x5] ss:$0 sm:$0xff] }
  0x3c   : > { %v314_v12 = vadd.f32 %v453_v10, %v186_v9  ;;  %v315_v16 = vadd.f32 %v454_v13, %v187_v11  ;;  %v316_v17 = vadd.f32 %v455_v15, %v188_v14  ;;  %v456_v19 = vld [vmem:[%s749_s4 + $0x6] ss:$0 sm:$0xff]  ;;  %v457_v22 = vld [vmem:[%s749_s4 + $0x7] ss:$0 sm:$0xff]  ;;  %v458_v24 = vld [vmem:[%s749_s4 + $0x8] ss:$0 sm:$0xff] }
  0x3d   : > { %328 = vst.msk [vmem:[%s752_s7] sm:$0x3] %vm327_vm0, %v311_v3  ;;  %329 = vst.msk [vmem:[%s752_s7 + $0x2] sm:$0x3] %vm327_vm0, %v312_v7  ;;  %v317_v21 = vadd.f32 %v456_v19, %v189_v18  ;;  %v318_v25 = vadd.f32 %v457_v22, %v190_v20  ;;  %v319_v26 = vadd.f32 %v458_v24, %v191_v23  ;;  %v459_v28 = vld [vmem:[%s749_s4 + $0x9] ss:$0 sm:$0xff] }
  0x3e   : > { %330 = vst.msk [vmem:[%s752_s7 + $0x4] sm:$0x3] %vm327_vm0, %v313_v8  ;;  %331 = vst.msk [vmem:[%s752_s7 + $0x6] sm:$0x3] %vm327_vm0, %v314_v12  ;;  %v193_v29 = vld [vmem:[%s739_s6 + $0x14] sm:$0x3]  ;;  %v320_v30 = vadd.f32 %v459_v28, %v192_v27 }
  0x3f   : > { %332 = vst.msk [vmem:[%s752_s7 + $0x8] sm:$0x3] %vm327_vm0, %v315_v16  ;;  %333 = vst.msk [vmem:[%s752_s7 + $0xa] sm:$0x3] %vm327_vm0, %v316_v17  ;;  %v460_v31 = vld [vmem:[%s749_s4 + $0xa] ss:$0 sm:$0xff] }
  0x40   : > { %334 = vst.msk [vmem:[%s752_s7 + $0xc] sm:$0x3] %vm327_vm0, %v317_v21  ;;  %v194_v32 = vld [vmem:[%s739_s6 + $0x16] sm:$0x3]  ;;  %v461_v33 = vld [vmem:[%s749_s4 + $0xb] ss:$0 sm:$0xff]  ;;  %v321_v34 = vadd.f32 %v460_v31, %v193_v29 }
  0x41   : > { %335 = vst.msk [vmem:[%s752_s7 + $0xe] sm:$0x3] %vm327_vm0, %v318_v25  ;;  %336 = vst.msk [vmem:[%s752_s7 + $0x10] sm:$0x3] %vm327_vm0, %v319_v26  ;;  %v322_v35 = vadd.f32 %v461_v33, %v194_v32  ;;  %v195_v36 = vld [vmem:[%s739_s6 + $0x18] sm:$0x3] }
  0x42   : > { %v462_v37 = vld [vmem:[%s749_s4 + $0xc] ss:$0 sm:$0xff]  ;;  %v196_v38 = vld [vmem:[%s739_s6 + $0x1a] sm:$0x3]  ;;  %337 = vst.msk [vmem:[%s752_s7 + $0x12] sm:$0x3] %vm327_vm0, %v320_v30 }
  0x43   : > { %v323_v39 = vadd.f32 %v462_v37, %v195_v36  ;;  %v463_v40 = vld [vmem:[%s749_s4 + $0xd] ss:$0 sm:$0xff]  ;;  %v197_v41 = vld [vmem:[%s739_s6 + $0x1c] sm:$0x3]  ;;  %v464_v42 = vld [vmem:[%s749_s4 + $0xe] ss:$0 sm:$0xff] }
  0x44   : > { %338 = vst.msk [vmem:[%s752_s7 + $0x14] sm:$0x3] %vm327_vm0, %v321_v34  ;;  %339 = vst.msk [vmem:[%s752_s7 + $0x16] sm:$0x3] %vm327_vm0, %v322_v35  ;;  %v324_v43 = vadd.f32 %v463_v40, %v196_v38  ;;  %v325_v44 = vadd.f32 %v464_v42, %v197_v41  ;;  %v198_v45 = vld [vmem:[%s739_s6 + $0x1e] sm:$0x3] }
  0x45   : > { %v465_v46 = vld [vmem:[%s749_s4 + $0xf] ss:$0 sm:$0xff]  ;;  %340 = vst.msk [vmem:[%s752_s7 + $0x18] sm:$0x3] %vm327_vm0, %v323_v39  ;;  %s551_s19 = scalar_lea.vmem %s820_s8, 512  ;;  %p882_p13 = scmp.ne.s32.totalorder %s878_s21, 0 }
  0x46   : > { %v326_v47 = vadd.f32 %v465_v46, %v198_v45  ;;  %341 = vst.msk [vmem:[%s752_s7 + $0x1a] sm:$0x3] %vm327_vm0, %v324_v43  ;;  %342 = vst.msk [vmem:[%s752_s7 + $0x1c] sm:$0x3] %vm327_vm0, %v325_v44  ;;  %p552_p12 = scmp.ne.s32.totalorder %s820_s8, %s551_s19  ;;  %s620_s23 = smov [#allocation5]  }
  0x47   : > { %s555_s24 = sshll.u32 %s620_s23, 4  ;;  %s556_s24 = int_to_ptr.vmem [resolvable:$false] %s555_s24 }
  0x48   : > { %343 = vst.msk [vmem:[%s752_s7 + $0x1e] sm:$0x3] %vm327_vm0, %v326_v47  ;;  %p553_p4 = pnand %p552_p12, %p882_p13  ;;  %s557_s25 = scalar_lea.vmem %s556_s24, 1024 }
  0x49   : > { %p558_p7 = scmp.lt.s32.totalorder %s820_s8, %s556_s24  ;;  %p559_p8 = scmp.lt.s32.totalorder %s557_s25, %s551_s19 }
  0x4a   : > { %p554_p5 = pneg %p553_p4 }
  0x4b   : > { %p560_p10 = por %p559_p8, %p558_p7 }
  0x4d   : > { %p561_p0 = pnand %p560_p10, %p554_p5 }
  0x4f   : > { %564 = shalt.err (!%p561_p0)
}
  0x50   : > { %s565_s26 = scalar_lea.hbm %s816_s17, 512  ;;  %s569_s6 = scalar_lea.hbm %s873_s2, 1024 }
  0x51   : > { %p566_p2 = scmp.ne.s32.totalorder %s816_s17, %s565_s26  ;;  %p570_p3 = scmp.lt.s32.totalorder %s816_s17, %s873_s2 }
  0x52   : > { %p571_p6 = scmp.lt.s32.totalorder %s569_s6, %s565_s26 }
  0x53   : > { %p567_p9 = pnand %p566_p2, %p882_p13 }
  0x54   : > { %p572_p11 = por %p571_p6, %p570_p3 }
  0x55   : > { %p568_p1 = pneg %p567_p9 }
  0x57   : > { %p573_p12 = pnand %p572_p11, %p568_p1 }
  0x59   : > { %576 = shalt.err (!%p573_p12)
}
  0x5a   : > { %s621_s3 = smov 32   ;;  %s622_s4 = smov 2  }
  0x5b   : > { %475 = dma.vmem_to_hbm [thread:$0]  (%p882_p13), %s820_s8, 512, %s816_s17, %s345_s13, %s621_s3, %s621_s3, %s622_s4  }
  0x5c PF: > { %s373_s20 = sand.u32 1, %s603_s9   ;;  %p883_p4 = scmp.ne.s32.totalorder %s879_s22, 0 }
  0x5d   : > { %p884_p5 = scmp.ge.s32.totalorder %s615_s12, 2  ;;  %s374_s7 = scalar_lea.sflag [#allocation4], %s373_s20 }
  0x5f   : > { %p482_p7 = pnand %p884_p5, %p883_p4 }
  0x61   : > { %p483_p8 = pneg %p482_p7 }
  0x63   : > { %598 = dma.done.wait (%p483_p8), %s374_s7, 512  }
  0x64   : > { %600 = vsyncadd (%p483_p8), %s374_s7, 4294966784  ;;  %p15_p10 = scmp.ge.s32.totalorder %s663_s15, 4   ;;  %s885_s9 = smov %s607_s10 }
  0x65   : > { %s886_s10 = smov %s611_s11  ;;  %s887_s11 = smov %s675_s18 }
  0x66   : > { %s888_s12 = smov %s663_s15  ;;  %17 = sbr.rel (!%p15_p10) target bundleno = 5 (0x5), region = 76 }
  0x6b   :  { %379 = vsyncpa [#allocation3], 1 }
  0x6c   :  { %381 = vsyncpa [#allocation3 + $0x1], 1 }
  0x6d   :  { %382 = vsyncpa [#allocation4], 1 }
  0x6e   :  { %384 = vsyncpa [#allocation4 + $0x1], 1 }

</bundles_post_ra>
